<compile_context>
chip_gen: v7x
topology: tpu7x:2x2x1
jax: 0.10.0
libtpu: 0.0.40
codegen_flags: <defaults>
</compile_context>

<pallas_src>
import functools

import jax
import jax.numpy as jnp
from jax.experimental import pallas as pl
from jax.experimental.pallas import tpu as pltpu

LANE = 128      # vreg lane width
SUBLANE = 8     # f32 sublane count


def _round_up(x, m):
    return ((x + m - 1) // m) * m


def lstm_fc_kernel(x_ref, w_ih_ref, w_hh_ref, b_ref, fcw_ref, fcb_ref,
                   logits_ref, gx_ref, *, hidden, seq_len, batch_tile):
    """LSTM recurrence + FC head for one batch tile.

    x_ref:      (T*TB, Ep)  bf16  time-major embedded tokens of this batch tile
    w_ih_ref:   (Ep, G4)    bf16  W_ih^T, gates packed contiguously, zero-padded
    w_hh_ref:   (HK, G4)    bf16  W_hh^T, rows >= hidden are zero
    b_ref:      (1, G4)     f32   b_ih + b_hh (packed, zero-padded)
    fcw_ref:    (HK, Cp)    bf16  FC weight^T, rows >= hidden are zero
    fcb_ref:    (1, Cp)     f32
    logits_ref: (TB, Cp)    f32
    gx_ref:     (T*TB, G4)  f32   VMEM scratch for the hoisted input projection
    """
    T, TB = seq_len, batch_tile
    HK, G4 = w_hh_ref.shape

    # (1) Input projection: ONE large MXU matmul over all T*TB rows, bias folded
    #     in here once.  No serial dependence -> fully off the recurrence path.
    gx_ref[...] = (
        jnp.dot(x_ref[...], w_ih_ref[...], preferred_element_type=jnp.float32)
        + b_ref[...]
    )

    w_hh = w_hh_ref[...]                       # hoisted, VMEM resident

    # (3) Per-lane constants for one fused EUP pass per step:
    #     sigmoid(x) = 0.5*tanh(0.5x) + 0.5 on i/f/o lanes, tanh(x) on g lanes.
    lane = jax.lax.broadcasted_iota(jnp.int32, (TB, G4), 1)
    is_g = (lane >= 2 * hidden) & (lane < 3 * hidden)
    pre = jnp.where(is_g, 1.0, 0.5).astype(jnp.float32)
    pmul = jnp.where(is_g, 1.0, 0.5).astype(jnp.float32)
    padd = jnp.where(is_g, 0.0, 0.5).astype(jnp.float32)

    # jnp.roll-style shifts that bring gate k (lanes [k*H,(k+1)*H)) to lane 0.
    roll_f = (G4 - 1 * hidden) % G4
    roll_g = (G4 - 2 * hidden) % G4
    roll_o = (G4 - 3 * hidden) % G4

    def step(t, carry):
        h, c = carry                                           # f32 (TB, HK)
        row = pl.multiple_of(t * TB, TB)
        # Serial-path matmul only: K = HK (= 128 here -> one MXU pass on v5e).
        gates = gx_ref[pl.ds(row, TB), :] + jnp.dot(
            h.astype(w_hh.dtype), w_hh, preferred_element_type=jnp.float32)
        act = jnp.tanh(gates * pre) * pmul + padd              # single EUP pass
        # Align each H-wide gate slab to lanes [0,H) via XLU rotation.
        i_v = act[:, :HK]
        f_v = pltpu.roll(act, shift=roll_f, axis=1)[:, :HK]
        g_v = pltpu.roll(act, shift=roll_g, axis=1)[:, :HK]
        o_v = pltpu.roll(act, shift=roll_o, axis=1)[:, :HK]
        c_new = f_v * c + i_v * g_v
        h_new = o_v * jnp.tanh(c_new)
        return h_new, c_new

    h0 = jnp.zeros((TB, HK), jnp.float32)
    c0 = jnp.zeros((TB, HK), jnp.float32)
    # (6) Adaptive unroll: ~8 live (TB, G4)-sized f32 tiles per step; keep them
    #     comfortably inside the 64-vreg file as shapes grow.
    tile_vregs = ((TB + SUBLANE - 1) // SUBLANE) * max(1, G4 // LANE)
    unroll = int(max(1, min(T, 64 // (8 * tile_vregs))))
    h, _ = jax.lax.fori_loop(0, T, step, (h0, c0), unroll=unroll)

    # Zero the junk lanes (>= hidden) once (not per step) before the FC head.
    lane_h = jax.lax.broadcasted_iota(jnp.int32, (TB, HK), 1)
    h = jnp.where(lane_h < hidden, h, 0.0)

    logits_ref[...] = (
        jnp.dot(h.astype(fcw_ref.dtype), fcw_ref[...],
                preferred_element_type=jnp.float32)
        + fcb_ref[...]
    ).astype(logits_ref.dtype)


def pack_params(params, compute_dtype=jnp.bfloat16):
    """Pad/stack natural (PyTorch-layout) params into MXU/lane-friendly operands.

    Gates stay packed contiguously along the 4H axis; only the TOTAL 4H width is
    padded to a multiple of 128 (G4).  All padded weight rows/cols are zero.
    """
    emb = params["embedding"]                    # (V, E)
    w_ih_t = params["w_ih_t"]                    # (E, 4H)
    w_hh_t = params["w_hh_t"]                    # (H, 4H)
    fc_w_t = params["fc_w_t"]                    # (H, C)
    V, E = emb.shape
    H = w_hh_t.shape[0]
    C = fc_w_t.shape[1]
    Ep = _round_up(E, LANE)
    G4 = _round_up(4 * H, LANE)                  # packed gate width
    HK = _round_up(H, LANE)                      # h/c slab width (matmul K)
    Cp = _round_up(C, LANE)

    w_ih_p = (jnp.zeros((Ep, G4), jnp.float32).at[:E, :4 * H].set(w_ih_t)
              .astype(compute_dtype))
    w_hh_p = (jnp.zeros((HK, G4), jnp.float32).at[:H, :4 * H].set(w_hh_t)
              .astype(compute_dtype))
    bias_p = (jnp.zeros((1, G4), jnp.float32)
              .at[0, :4 * H].set(params["b_ih"] + params["b_hh"]))
    emb_p = (jnp.zeros((V, Ep), jnp.float32).at[:, :E].set(emb)
             .astype(compute_dtype))
    fc_w_p = (jnp.zeros((HK, Cp), jnp.float32).at[:H, :C].set(fc_w_t)
              .astype(compute_dtype))
    fc_b_p = jnp.zeros((1, Cp), jnp.float32).at[0, :C].set(params["fc_b"])

    return {
        "embedding": emb_p,
        "w_ih": w_ih_p,
        "w_hh": w_hh_p,
        "bias": bias_p,
        "fc_w": fc_w_p,
        "fc_b": fc_b_p,
        "hidden_dim": H,
        "num_classes": C,
    }


def rnn_model_forward(tokens, packed, *, batch_tile=8):
    """tokens: (B, T) int32 -> logits (B, num_classes) f32."""
    assert batch_tile % SUBLANE == 0
    B, T = tokens.shape
    H = packed["hidden_dim"]
    C = packed["num_classes"]
    Ep = packed["embedding"].shape[1]
    HK, G4 = packed["w_hh"].shape
    Cp = packed["fc_w"].shape[1]

    TB = batch_tile
    Bp = _round_up(max(B, TB), TB)
    G = Bp // TB                                  # batch tiles ("parallel" grid)

    # Pad batch with token id 0 (padding_idx row is zero); padded rows sliced off.
    tokens_p = jnp.zeros((Bp, T), tokens.dtype).at[:B].set(tokens)
    # Per-batch-tile, time-major token ids: idx[g, t*TB + i] = tokens_p[g*TB+i, t]
    idx = tokens_p.reshape(G, TB, T).transpose(0, 2, 1).reshape(G, T * TB)
    # Embedding gather kept as JAX glue (dynamic gather).
    x = jnp.take(packed["embedding"], idx, axis=0)          # (G, T*TB, Ep) bf16

    kernel = functools.partial(lstm_fc_kernel, hidden=H, seq_len=T,
                               batch_tile=TB)

    logits_p = pl.pallas_call(
        kernel,
        out_shape=jax.ShapeDtypeStruct((Bp, Cp), jnp.float32),
        grid_spec=pltpu.PrefetchScalarGridSpec(
            num_scalar_prefetch=0,
            grid=(G,),
            in_specs=[
                pl.BlockSpec((None, T * TB, Ep), lambda g: (g, 0, 0)),
                pl.BlockSpec((Ep, G4), lambda g: (0, 0)),
                pl.BlockSpec((HK, G4), lambda g: (0, 0)),
                pl.BlockSpec((1, G4), lambda g: (0, 0)),
                pl.BlockSpec((HK, Cp), lambda g: (0, 0)),
                pl.BlockSpec((1, Cp), lambda g: (0, 0)),
            ],
            out_specs=pl.BlockSpec((TB, Cp), lambda g: (g, 0)),
            scratch_shapes=[pltpu.VMEM((T * TB, G4), jnp.float32)],
        ),
        compiler_params=pltpu.CompilerParams(
            dimension_semantics=("parallel",),       # v7x: batch tiles across TCs
            vmem_limit_bytes=32 * 1024 * 1024,       # explicit (v5e default is 16 MiB)
        ),
    )(x, packed["w_ih"], packed["w_hh"], packed["bias"],
      packed["fc_w"], packed["fc_b"])

    return logits_p[:B, :C]


def reference_forward(tokens, params):
    """Pure-JAX f32 reference of the PyTorch module's forward (for checking)."""
    x = jnp.take(params["embedding"], tokens, axis=0)  # (B, T, E)
    B, T, _ = x.shape
    H = params["w_hh_t"].shape[0]
    h = jnp.zeros((B, H), jnp.float32)
    c = jnp.zeros((B, H), jnp.float32)
    b = params["b_ih"] + params["b_hh"]
    for t in range(T):
        gates = x[:, t, :] @ params["w_ih_t"] + h @ params["w_hh_t"] + b
        i = jax.nn.sigmoid(gates[:, :H])
        f = jax.nn.sigmoid(gates[:, H:2 * H])
        g = jnp.tanh(gates[:, 2 * H:3 * H])
        o = jax.nn.sigmoid(gates[:, 3 * H:4 * H])
        c = f * c + i * g
        h = o * jnp.tanh(c)
    return h @ params["fc_w_t"] + params["fc_b"]


def init_params(key, vocab_size, embedding_dim, hidden_dim, num_classes):
    ks = jax.random.split(key, 7)
    emb = jax.random.normal(ks[0], (vocab_size, embedding_dim), jnp.float32) * 0.1
    emb = emb.at[0].set(0.0)  # padding_idx=0 row is zero
    # LSTM weights (PyTorch layout is (4H, in); stored transposed for x @ W^T),
    # gate order [i, f, g, o] along the 4H axis as in nn.LSTM.
    w_ih_t = jax.random.normal(ks[1], (embedding_dim, 4 * hidden_dim), jnp.float32) * 0.1
    w_hh_t = jax.random.normal(ks[2], (hidden_dim, 4 * hidden_dim), jnp.float32) * 0.1
    b_ih = jax.random.normal(ks[3], (4 * hidden_dim,), jnp.float32) * 0.1
    b_hh = jax.random.normal(ks[4], (4 * hidden_dim,), jnp.float32) * 0.1
    fc_w_t = jax.random.normal(ks[5], (hidden_dim, num_classes), jnp.float32) * 0.1
    fc_b = jax.random.normal(ks[6], (num_classes,), jnp.float32) * 0.1
    return {
        "embedding": emb,
        "w_ih_t": w_ih_t,
        "w_hh_t": w_hh_t,
        "b_ih": b_ih,
        "b_hh": b_hh,
        "fc_w_t": fc_w_t,
        "fc_b": fc_b,
    }


if __name__ == "__main__":
    vocab_size = 20
    embedding_dim = 16
    hidden_dim = 32
    sentence_length = 8
    num_classes = 5
    batch = 2

    key = jax.random.PRNGKey(0)
    pkey, tkey = jax.random.split(key)
    params = init_params(pkey, vocab_size, embedding_dim, hidden_dim, num_classes)
    packed = pack_params(params)
    tokens = jax.random.randint(tkey, (batch, sentence_length), 0, vocab_size,
                                dtype=jnp.int32)

    logits = rnn_model_forward(tokens, packed)
    jax.block_until_ready(logits)
    assert logits.shape == (batch, num_classes)

    # Numerical sanity check vs. pure-JAX f32 reference (loose tol: bf16 weights).
    ref = reference_forward(tokens, params)
    err = float(jnp.max(jnp.abs(logits - ref)))
    assert err < 5e-2, f"max abs error {err} too large"

    print("KERNEL_OK")
</pallas_src>

<mosaic_0001>
module attributes {stable_mosaic.version = 11 : i64} {
  func.func @lstm_fc_kernel(%arg0: i32, %arg1: memref<1x64x128xbf16, #tpu.memory_space<vmem>>, %arg2: memref<128x128xbf16, #tpu.memory_space<vmem>>, %arg3: memref<128x128xbf16, #tpu.memory_space<vmem>>, %arg4: memref<1x128xf32, #tpu.memory_space<vmem>>, %arg5: memref<128x128xbf16, #tpu.memory_space<vmem>>, %arg6: memref<1x128xf32, #tpu.memory_space<vmem>>, %arg7: memref<8x128xf32, #tpu.memory_space<vmem>>, %arg8: memref<64x128xf32, #tpu.memory_space<vmem>>) attributes {dimension_semantics = [#tpu.dimension_semantics<parallel>], iteration_bounds = array<i64: 1>, scalar_prefetch = 0 : i64, scratch_operands = 1 : i64, tpu.core_type = #tpu.core_type<tc>, window_params = [{transform_indices = @transform_0, window_bounds = array<i64: 1, 64, 128>}, {pipeline_mode = #tpu.pipeline_mode<synchronous>, transform_indices = @transform_1, window_bounds = array<i64: 128, 128>}, {pipeline_mode = #tpu.pipeline_mode<synchronous>, transform_indices = @transform_2, window_bounds = array<i64: 128, 128>}, {pipeline_mode = #tpu.pipeline_mode<synchronous>, transform_indices = @transform_3, window_bounds = array<i64: 1, 128>}, {pipeline_mode = #tpu.pipeline_mode<synchronous>, transform_indices = @transform_4, window_bounds = array<i64: 128, 128>}, {pipeline_mode = #tpu.pipeline_mode<synchronous>, transform_indices = @transform_5, window_bounds = array<i64: 1, 128>}, {transform_indices = @transform_6, window_bounds = array<i64: 8, 128>}]} {
    %c0 = arith.constant 0 : index
    %c0_0 = arith.constant 0 : index
    %c0_1 = arith.constant 0 : index
    %0 = vector.load %arg1[%c0, %c0_0, %c0_1] : memref<1x64x128xbf16, #tpu.memory_space<vmem>>, vector<1x64x128xbf16>
    %1 = vector.shape_cast %0 : vector<1x64x128xbf16> to vector<64x128xbf16>
    %c0_2 = arith.constant 0 : index
    %c0_3 = arith.constant 0 : index
    %2 = vector.load %arg2[%c0_2, %c0_3] : memref<128x128xbf16, #tpu.memory_space<vmem>>, vector<128x128xbf16>
    %cst = arith.constant dense<0.000000e+00> : vector<64x128xf32>
    %3 = tpu.matmul %1, %2, %cst {dimension_numbers = #tpu.dot_dimension_numbers<[1], [0], [0], [1], [0, 0, 1, 1], [], []>} : vector<64x128xbf16>, vector<128x128xbf16>, vector<64x128xf32> -> vector<64x128xf32>
    %c0_4 = arith.constant 0 : index
    %c0_5 = arith.constant 0 : index
    %4 = vector.load %arg4[%c0_4, %c0_5] : memref<1x128xf32, #tpu.memory_space<vmem>>, vector<1x128xf32>
    %5 = vector.broadcast %4 : vector<1x128xf32> to vector<64x128xf32>
    %6 = arith.addf %3, %5 : vector<64x128xf32>
    %c0_6 = arith.constant 0 : index
    %c0_7 = arith.constant 0 : index
    %7 = vector.load %arg8[%c0_6, %c0_7] : memref<64x128xf32, #tpu.memory_space<vmem>>, vector<64x128xf32>
    tpu.vector_store %arg8[%c0_6, %c0_7], %6 {strides = array<i32>} : memref<64x128xf32, #tpu.memory_space<vmem>>, vector<64x128xf32>,
    %c0_8 = arith.constant 0 : index
    %c0_9 = arith.constant 0 : index
    %8 = vector.load %arg3[%c0_8, %c0_9] : memref<128x128xbf16, #tpu.memory_space<vmem>>, vector<128x128xbf16>
    %9 = tpu.iota {dimensions = array<i32: 1>} : vector<8x128xi32>
    %c64_i32 = arith.constant 64 : i32
    %10 = vector.broadcast %c64_i32 : i32 to vector<8x128xi32>
    %11 = arith.cmpi sge, %9, %10 : vector<8x128xi32>
    %c96_i32 = arith.constant 96 : i32
    %12 = vector.broadcast %c96_i32 : i32 to vector<8x128xi32>
    %13 = arith.cmpi slt, %9, %12 : vector<8x128xi32>
    %14 = arith.andi %11, %13 : vector<8x128xi1>
    %cst_10 = arith.constant 1.000000e+00 : f32
    %cst_11 = arith.constant 5.000000e-01 : f32
    %15 = vector.broadcast %cst_10 : f32 to vector<8x128xf32>
    %16 = vector.broadcast %cst_11 : f32 to vector<8x128xf32>
    %17 = arith.select %14, %15, %16 : vector<8x128xi1>, vector<8x128xf32>
    %cst_12 = arith.constant 1.000000e+00 : f32
    %cst_13 = arith.constant 5.000000e-01 : f32
    %18 = vector.broadcast %cst_12 : f32 to vector<8x128xf32>
    %19 = vector.broadcast %cst_13 : f32 to vector<8x128xf32>
    %20 = arith.select %14, %18, %19 : vector<8x128xi1>, vector<8x128xf32>
    %cst_14 = arith.constant 0.000000e+00 : f32
    %cst_15 = arith.constant 5.000000e-01 : f32
    %21 = vector.broadcast %cst_14 : f32 to vector<8x128xf32>
    %22 = vector.broadcast %cst_15 : f32 to vector<8x128xf32>
    %23 = arith.select %14, %21, %22 : vector<8x128xi1>, vector<8x128xf32>
    %cst_16 = arith.constant 0.000000e+00 : f32
    %24 = vector.broadcast %cst_16 : f32 to vector<8x128xf32>
    %cst_17 = arith.constant 0.000000e+00 : f32
    %25 = vector.broadcast %cst_17 : f32 to vector<8x128xf32>
    %c0_i32 = arith.constant 0 : i32
    %c8_i32 = arith.constant 8 : i32
    %26 = arith.muli %c0_i32, %c8_i32 : i32
    %27 = tpu.assume_multiple %26, 8 : i32
    %28 = arith.index_cast %27 : i32 to index
    %c0_18 = arith.constant 0 : index
    %29 = vector.load %arg8[%28, %c0_18] : memref<64x128xf32, #tpu.memory_space<vmem>>, vector<8x128xf32>
    %30 = arith.truncf %24 : vector<8x128xf32> to vector<8x128xbf16>
    %cst_19 = arith.constant dense<0.000000e+00> : vector<8x128xf32>
    %31 = tpu.matmul %30, %8, %cst_19 {dimension_numbers = #tpu.dot_dimension_numbers<[1], [0], [0], [1], [0, 0, 1, 1], [], []>} : vector<8x128xbf16>, vector<128x128xbf16>, vector<8x128xf32> -> vector<8x128xf32>
    %32 = arith.addf %29, %31 : vector<8x128xf32>
    %33 = arith.mulf %32, %17 : vector<8x128xf32>
    %34 = math.tanh %33 : vector<8x128xf32>
    %35 = arith.mulf %34, %20 : vector<8x128xf32>
    %36 = arith.addf %35, %23 : vector<8x128xf32>
    %c96_i32_20 = arith.constant 96 : i32
    %37 = tpu.dynamic_rotate %36 by %c96_i32_20 dim 1 : vector<8x128xf32>, i32 -> vector<8x128xf32>
    %c64_i32_21 = arith.constant 64 : i32
    %38 = tpu.dynamic_rotate %36 by %c64_i32_21 dim 1 : vector<8x128xf32>, i32 -> vector<8x128xf32>
    %c32_i32 = arith.constant 32 : i32
    %39 = tpu.dynamic_rotate %36 by %c32_i32 dim 1 : vector<8x128xf32>, i32 -> vector<8x128xf32>
    %40 = arith.mulf %37, %25 : vector<8x128xf32>
    %41 = arith.mulf %36, %38 : vector<8x128xf32>
    %42 = arith.addf %40, %41 : vector<8x128xf32>
    %43 = math.tanh %42 : vector<8x128xf32>
    %44 = arith.mulf %39, %43 : vector<8x128xf32>
    %c1_i32 = arith.constant 1 : i32
    %c8_i32_22 = arith.constant 8 : i32
    %45 = arith.muli %c1_i32, %c8_i32_22 : i32
    %46 = tpu.assume_multiple %45, 8 : i32
    %47 = arith.index_cast %46 : i32 to index
    %c0_23 = arith.constant 0 : index
    %48 = vector.load %arg8[%47, %c0_23] : memref<64x128xf32, #tpu.memory_space<vmem>>, vector<8x128xf32>
    %49 = arith.truncf %44 : vector<8x128xf32> to vector<8x128xbf16>
    %cst_24 = arith.constant dense<0.000000e+00> : vector<8x128xf32>
    %50 = tpu.matmul %49, %8, %cst_24 {dimension_numbers = #tpu.dot_dimension_numbers<[1], [0], [0], [1], [0, 0, 1, 1], [], []>} : vector<8x128xbf16>, vector<128x128xbf16>, vector<8x128xf32> -> vector<8x128xf32>
    %51 = arith.addf %48, %50 : vector<8x128xf32>
    %52 = arith.mulf %51, %17 : vector<8x128xf32>
    %53 = math.tanh %52 : vector<8x128xf32>
    %54 = arith.mulf %53, %20 : vector<8x128xf32>
    %55 = arith.addf %54, %23 : vector<8x128xf32>
    %c96_i32_25 = arith.constant 96 : i32
    %56 = tpu.dynamic_rotate %55 by %c96_i32_25 dim 1 : vector<8x128xf32>, i32 -> vector<8x128xf32>
    %c64_i32_26 = arith.constant 64 : i32
    %57 = tpu.dynamic_rotate %55 by %c64_i32_26 dim 1 : vector<8x128xf32>, i32 -> vector<8x128xf32>
    %c32_i32_27 = arith.constant 32 : i32
    %58 = tpu.dynamic_rotate %55 by %c32_i32_27 dim 1 : vector<8x128xf32>, i32 -> vector<8x128xf32>
    %59 = arith.mulf %56, %42 : vector<8x128xf32>
    %60 = arith.mulf %55, %57 : vector<8x128xf32>
    %61 = arith.addf %59, %60 : vector<8x128xf32>
    %62 = math.tanh %61 : vector<8x128xf32>
    %63 = arith.mulf %58, %62 : vector<8x128xf32>
    %c2_i32 = arith.constant 2 : i32
    %c8_i32_28 = arith.constant 8 : i32
    %64 = arith.muli %c2_i32, %c8_i32_28 : i32
    %65 = tpu.assume_multiple %64, 8 : i32
    %66 = arith.index_cast %65 : i32 to index
    %c0_29 = arith.constant 0 : index
    %67 = vector.load %arg8[%66, %c0_29] : memref<64x128xf32, #tpu.memory_space<vmem>>, vector<8x128xf32>
    %68 = arith.truncf %63 : vector<8x128xf32> to vector<8x128xbf16>
    %cst_30 = arith.constant dense<0.000000e+00> : vector<8x128xf32>
    %69 = tpu.matmul %68, %8, %cst_30 {dimension_numbers = #tpu.dot_dimension_numbers<[1], [0], [0], [1], [0, 0, 1, 1], [], []>} : vector<8x128xbf16>, vector<128x128xbf16>, vector<8x128xf32> -> vector<8x128xf32>
    %70 = arith.addf %67, %69 : vector<8x128xf32>
    %71 = arith.mulf %70, %17 : vector<8x128xf32>
    %72 = math.tanh %71 : vector<8x128xf32>
    %73 = arith.mulf %72, %20 : vector<8x128xf32>
    %74 = arith.addf %73, %23 : vector<8x128xf32>
    %c96_i32_31 = arith.constant 96 : i32
    %75 = tpu.dynamic_rotate %74 by %c96_i32_31 dim 1 : vector<8x128xf32>, i32 -> vector<8x128xf32>
    %c64_i32_32 = arith.constant 64 : i32
    %76 = tpu.dynamic_rotate %74 by %c64_i32_32 dim 1 : vector<8x128xf32>, i32 -> vector<8x128xf32>
    %c32_i32_33 = arith.constant 32 : i32
    %77 = tpu.dynamic_rotate %74 by %c32_i32_33 dim 1 : vector<8x128xf32>, i32 -> vector<8x128xf32>
    %78 = arith.mulf %75, %61 : vector<8x128xf32>
    %79 = arith.mulf %74, %76 : vector<8x128xf32>
    %80 = arith.addf %78, %79 : vector<8x128xf32>
    %81 = math.tanh %80 : vector<8x128xf32>
    %82 = arith.mulf %77, %81 : vector<8x128xf32>
    %c3_i32 = arith.constant 3 : i32
    %c8_i32_34 = arith.constant 8 : i32
    %83 = arith.muli %c3_i32, %c8_i32_34 : i32
    %84 = tpu.assume_multiple %83, 8 : i32
    %85 = arith.index_cast %84 : i32 to index
    %c0_35 = arith.constant 0 : index
    %86 = vector.load %arg8[%85, %c0_35] : memref<64x128xf32, #tpu.memory_space<vmem>>, vector<8x128xf32>
    %87 = arith.truncf %82 : vector<8x128xf32> to vector<8x128xbf16>
    %cst_36 = arith.constant dense<0.000000e+00> : vector<8x128xf32>
    %88 = tpu.matmul %87, %8, %cst_36 {dimension_numbers = #tpu.dot_dimension_numbers<[1], [0], [0], [1], [0, 0, 1, 1], [], []>} : vector<8x128xbf16>, vector<128x128xbf16>, vector<8x128xf32> -> vector<8x128xf32>
    %89 = arith.addf %86, %88 : vector<8x128xf32>
    %90 = arith.mulf %89, %17 : vector<8x128xf32>
    %91 = math.tanh %90 : vector<8x128xf32>
    %92 = arith.mulf %91, %20 : vector<8x128xf32>
    %93 = arith.addf %92, %23 : vector<8x128xf32>
    %c96_i32_37 = arith.constant 96 : i32
    %94 = tpu.dynamic_rotate %93 by %c96_i32_37 dim 1 : vector<8x128xf32>, i32 -> vector<8x128xf32>
    %c64_i32_38 = arith.constant 64 : i32
    %95 = tpu.dynamic_rotate %93 by %c64_i32_38 dim 1 : vector<8x128xf32>, i32 -> vector<8x128xf32>
    %c32_i32_39 = arith.constant 32 : i32
    %96 = tpu.dynamic_rotate %93 by %c32_i32_39 dim 1 : vector<8x128xf32>, i32 -> vector<8x128xf32>
    %97 = arith.mulf %94, %80 : vector<8x128xf32>
    %98 = arith.mulf %93, %95 : vector<8x128xf32>
    %99 = arith.addf %97, %98 : vector<8x128xf32>
    %100 = math.tanh %99 : vector<8x128xf32>
    %101 = arith.mulf %96, %100 : vector<8x128xf32>
    %c4_i32 = arith.constant 4 : i32
    %c8_i32_40 = arith.constant 8 : i32
    %102 = arith.muli %c4_i32, %c8_i32_40 : i32
    %103 = tpu.assume_multiple %102, 8 : i32
    %104 = arith.index_cast %103 : i32 to index
    %c0_41 = arith.constant 0 : index
    %105 = vector.load %arg8[%104, %c0_41] : memref<64x128xf32, #tpu.memory_space<vmem>>, vector<8x128xf32>
    %106 = arith.truncf %101 : vector<8x128xf32> to vector<8x128xbf16>
    %cst_42 = arith.constant dense<0.000000e+00> : vector<8x128xf32>
    %107 = tpu.matmul %106, %8, %cst_42 {dimension_numbers = #tpu.dot_dimension_numbers<[1], [0], [0], [1], [0, 0, 1, 1], [], []>} : vector<8x128xbf16>, vector<128x128xbf16>, vector<8x128xf32> -> vector<8x128xf32>
    %108 = arith.addf %105, %107 : vector<8x128xf32>
    %109 = arith.mulf %108, %17 : vector<8x128xf32>
    %110 = math.tanh %109 : vector<8x128xf32>
    %111 = arith.mulf %110, %20 : vector<8x128xf32>
    %112 = arith.addf %111, %23 : vector<8x128xf32>
    %c96_i32_43 = arith.constant 96 : i32
    %113 = tpu.dynamic_rotate %112 by %c96_i32_43 dim 1 : vector<8x128xf32>, i32 -> vector<8x128xf32>
    %c64_i32_44 = arith.constant 64 : i32
    %114 = tpu.dynamic_rotate %112 by %c64_i32_44 dim 1 : vector<8x128xf32>, i32 -> vector<8x128xf32>
    %c32_i32_45 = arith.constant 32 : i32
    %115 = tpu.dynamic_rotate %112 by %c32_i32_45 dim 1 : vector<8x128xf32>, i32 -> vector<8x128xf32>
    %116 = arith.mulf %113, %99 : vector<8x128xf32>
    %117 = arith.mulf %112, %114 : vector<8x128xf32>
    %118 = arith.addf %116, %117 : vector<8x128xf32>
    %119 = math.tanh %118 : vector<8x128xf32>
    %120 = arith.mulf %115, %119 : vector<8x128xf32>
    %c5_i32 = arith.constant 5 : i32
    %c8_i32_46 = arith.constant 8 : i32
    %121 = arith.muli %c5_i32, %c8_i32_46 : i32
    %122 = tpu.assume_multiple %121, 8 : i32
    %123 = arith.index_cast %122 : i32 to index
    %c0_47 = arith.constant 0 : index
    %124 = vector.load %arg8[%123, %c0_47] : memref<64x128xf32, #tpu.memory_space<vmem>>, vector<8x128xf32>
    %125 = arith.truncf %120 : vector<8x128xf32> to vector<8x128xbf16>
    %cst_48 = arith.constant dense<0.000000e+00> : vector<8x128xf32>
    %126 = tpu.matmul %125, %8, %cst_48 {dimension_numbers = #tpu.dot_dimension_numbers<[1], [0], [0], [1], [0, 0, 1, 1], [], []>} : vector<8x128xbf16>, vector<128x128xbf16>, vector<8x128xf32> -> vector<8x128xf32>
    %127 = arith.addf %124, %126 : vector<8x128xf32>
    %128 = arith.mulf %127, %17 : vector<8x128xf32>
    %129 = math.tanh %128 : vector<8x128xf32>
    %130 = arith.mulf %129, %20 : vector<8x128xf32>
    %131 = arith.addf %130, %23 : vector<8x128xf32>
    %c96_i32_49 = arith.constant 96 : i32
    %132 = tpu.dynamic_rotate %131 by %c96_i32_49 dim 1 : vector<8x128xf32>, i32 -> vector<8x128xf32>
    %c64_i32_50 = arith.constant 64 : i32
    %133 = tpu.dynamic_rotate %131 by %c64_i32_50 dim 1 : vector<8x128xf32>, i32 -> vector<8x128xf32>
    %c32_i32_51 = arith.constant 32 : i32
    %134 = tpu.dynamic_rotate %131 by %c32_i32_51 dim 1 : vector<8x128xf32>, i32 -> vector<8x128xf32>
    %135 = arith.mulf %132, %118 : vector<8x128xf32>
    %136 = arith.mulf %131, %133 : vector<8x128xf32>
    %137 = arith.addf %135, %136 : vector<8x128xf32>
    %138 = math.tanh %137 : vector<8x128xf32>
    %139 = arith.mulf %134, %138 : vector<8x128xf32>
    %c6_i32 = arith.constant 6 : i32
    %c8_i32_52 = arith.constant 8 : i32
    %140 = arith.muli %c6_i32, %c8_i32_52 : i32
    %141 = tpu.assume_multiple %140, 8 : i32
    %142 = arith.index_cast %141 : i32 to index
    %c0_53 = arith.constant 0 : index
    %143 = vector.load %arg8[%142, %c0_53] : memref<64x128xf32, #tpu.memory_space<vmem>>, vector<8x128xf32>
    %144 = arith.truncf %139 : vector<8x128xf32> to vector<8x128xbf16>
    %cst_54 = arith.constant dense<0.000000e+00> : vector<8x128xf32>
    %145 = tpu.matmul %144, %8, %cst_54 {dimension_numbers = #tpu.dot_dimension_numbers<[1], [0], [0], [1], [0, 0, 1, 1], [], []>} : vector<8x128xbf16>, vector<128x128xbf16>, vector<8x128xf32> -> vector<8x128xf32>
    %146 = arith.addf %143, %145 : vector<8x128xf32>
    %147 = arith.mulf %146, %17 : vector<8x128xf32>
    %148 = math.tanh %147 : vector<8x128xf32>
    %149 = arith.mulf %148, %20 : vector<8x128xf32>
    %150 = arith.addf %149, %23 : vector<8x128xf32>
    %c96_i32_55 = arith.constant 96 : i32
    %151 = tpu.dynamic_rotate %150 by %c96_i32_55 dim 1 : vector<8x128xf32>, i32 -> vector<8x128xf32>
    %c64_i32_56 = arith.constant 64 : i32
    %152 = tpu.dynamic_rotate %150 by %c64_i32_56 dim 1 : vector<8x128xf32>, i32 -> vector<8x128xf32>
    %c32_i32_57 = arith.constant 32 : i32
    %153 = tpu.dynamic_rotate %150 by %c32_i32_57 dim 1 : vector<8x128xf32>, i32 -> vector<8x128xf32>
    %154 = arith.mulf %151, %137 : vector<8x128xf32>
    %155 = arith.mulf %150, %152 : vector<8x128xf32>
    %156 = arith.addf %154, %155 : vector<8x128xf32>
    %157 = math.tanh %156 : vector<8x128xf32>
    %158 = arith.mulf %153, %157 : vector<8x128xf32>
    %c7_i32 = arith.constant 7 : i32
    %c8_i32_58 = arith.constant 8 : i32
    %159 = arith.muli %c7_i32, %c8_i32_58 : i32
    %160 = tpu.assume_multiple %159, 8 : i32
    %161 = arith.index_cast %160 : i32 to index
    %c0_59 = arith.constant 0 : index
    %162 = vector.load %arg8[%161, %c0_59] : memref<64x128xf32, #tpu.memory_space<vmem>>, vector<8x128xf32>
    %163 = arith.truncf %158 : vector<8x128xf32> to vector<8x128xbf16>
    %cst_60 = arith.constant dense<0.000000e+00> : vector<8x128xf32>
    %164 = tpu.matmul %163, %8, %cst_60 {dimension_numbers = #tpu.dot_dimension_numbers<[1], [0], [0], [1], [0, 0, 1, 1], [], []>} : vector<8x128xbf16>, vector<128x128xbf16>, vector<8x128xf32> -> vector<8x128xf32>
    %165 = arith.addf %162, %164 : vector<8x128xf32>
    %166 = arith.mulf %165, %17 : vector<8x128xf32>
    %167 = math.tanh %166 : vector<8x128xf32>
    %168 = arith.mulf %167, %20 : vector<8x128xf32>
    %169 = arith.addf %168, %23 : vector<8x128xf32>
    %c96_i32_61 = arith.constant 96 : i32
    %170 = tpu.dynamic_rotate %169 by %c96_i32_61 dim 1 : vector<8x128xf32>, i32 -> vector<8x128xf32>
    %c64_i32_62 = arith.constant 64 : i32
    %171 = tpu.dynamic_rotate %169 by %c64_i32_62 dim 1 : vector<8x128xf32>, i32 -> vector<8x128xf32>
    %c32_i32_63 = arith.constant 32 : i32
    %172 = tpu.dynamic_rotate %169 by %c32_i32_63 dim 1 : vector<8x128xf32>, i32 -> vector<8x128xf32>
    %173 = arith.mulf %170, %156 : vector<8x128xf32>
    %174 = arith.mulf %169, %171 : vector<8x128xf32>
    %175 = arith.addf %173, %174 : vector<8x128xf32>
    %176 = math.tanh %175 : vector<8x128xf32>
    %177 = arith.mulf %172, %176 : vector<8x128xf32>
    %c8_i32_64 = arith.constant 8 : i32
    %178 = tpu.iota {dimensions = array<i32: 1>} : vector<8x128xi32>
    %c32_i32_65 = arith.constant 32 : i32
    %179 = vector.broadcast %c32_i32_65 : i32 to vector<8x128xi32>
    %180 = arith.cmpi slt, %178, %179 : vector<8x128xi32>
    %cst_66 = arith.constant 0.000000e+00 : f32
    %181 = vector.broadcast %cst_66 : f32 to vector<8x128xf32>
    %182 = arith.select %180, %177, %181 : vector<8x128xi1>, vector<8x128xf32>
    %183 = arith.truncf %182 : vector<8x128xf32> to vector<8x128xbf16>
    %c0_67 = arith.constant 0 : index
    %c0_68 = arith.constant 0 : index
    %184 = vector.load %arg5[%c0_67, %c0_68] : memref<128x128xbf16, #tpu.memory_space<vmem>>, vector<128x128xbf16>
    %cst_69 = arith.constant dense<0.000000e+00> : vector<8x128xf32>
    %185 = tpu.matmul %183, %184, %cst_69 {dimension_numbers = #tpu.dot_dimension_numbers<[1], [0], [0], [1], [0, 0, 1, 1], [], []>} : vector<8x128xbf16>, vector<128x128xbf16>, vector<8x128xf32> -> vector<8x128xf32>
    %c0_70 = arith.constant 0 : index
    %c0_71 = arith.constant 0 : index
    %186 = vector.load %arg6[%c0_70, %c0_71] : memref<1x128xf32, #tpu.memory_space<vmem>>, vector<1x128xf32>
    %187 = vector.broadcast %186 : vector<1x128xf32> to vector<8x128xf32>
    %188 = arith.addf %185, %187 : vector<8x128xf32>
    %c0_72 = arith.constant 0 : index
    %c0_73 = arith.constant 0 : index
    %189 = vector.load %arg7[%c0_72, %c0_73] : memref<8x128xf32, #tpu.memory_space<vmem>>, vector<8x128xf32>
    tpu.vector_store %arg7[%c0_72, %c0_73], %188 {strides = array<i32>} : memref<8x128xf32, #tpu.memory_space<vmem>>, vector<8x128xf32>,
    return
  }
  func.func @transform_0(%arg0: i32) -> (i32, i32, i32) {
    %c0_i32 = arith.constant 0 : i32
    %c0_i32_0 = arith.constant 0 : i32
    %c0_i32_1 = arith.constant 0 : i32
    return %arg0, %c0_i32, %c0_i32_0 : i32, i32, i32
  }
  func.func @transform_1(%arg0: i32) -> (i32, i32) {
    %c0_i32 = arith.constant 0 : i32
    %c0_i32_0 = arith.constant 0 : i32
    %c0_i32_1 = arith.constant 0 : i32
    return %c0_i32, %c0_i32_0 : i32, i32
  }
  func.func @transform_2(%arg0: i32) -> (i32, i32) {
    %c0_i32 = arith.constant 0 : i32
    %c0_i32_0 = arith.constant 0 : i32
    %c0_i32_1 = arith.constant 0 : i32
    return %c0_i32, %c0_i32_0 : i32, i32
  }
  func.func @transform_3(%arg0: i32) -> (i32, i32) {
    %c0_i32 = arith.constant 0 : i32
    %c0_i32_0 = arith.constant 0 : i32
    %c0_i32_1 = arith.constant 0 : i32
    return %c0_i32, %c0_i32_0 : i32, i32
  }
  func.func @transform_4(%arg0: i32) -> (i32, i32) {
    %c0_i32 = arith.constant 0 : i32
    %c0_i32_0 = arith.constant 0 : i32
    %c0_i32_1 = arith.constant 0 : i32
    return %c0_i32, %c0_i32_0 : i32, i32
  }
  func.func @transform_5(%arg0: i32) -> (i32, i32) {
    %c0_i32 = arith.constant 0 : i32
    %c0_i32_0 = arith.constant 0 : i32
    %c0_i32_1 = arith.constant 0 : i32
    return %c0_i32, %c0_i32_0 : i32, i32
  }
  func.func @transform_6(%arg0: i32) -> (i32, i32) {
    %c0_i32 = arith.constant 0 : i32
    %c0_i32_0 = arith.constant 0 : i32
    return %arg0, %c0_i32 : i32, i32
  }
}

</mosaic_0001>

<bundles_post_ra>
// kernel: tpu_custom_call.1
= control target key start
LH: loop header
LB: loop body
LE: loop exit
PB: predicated region body
PF: predicated region fallthrough
CT: control target
= control target key end

     0   :  { %11 = vsyncpa [#allocation4], 0  ;;  %s1845_s0 = inlined_call_operand.hbm [shape: bf16[1,64,128], index: 0, kind: input, shape index: {}]   ;;  %s1846_s1 = inlined_call_operand.hbm [shape: bf16[128,128], index: 1, kind: input, shape index: {}]   ;;  %s1847_s2 = inlined_call_operand.hbm [shape: bf16[128,128], index: 2, kind: input, shape index: {}]   ;;  %s1848_s3 = inlined_call_operand.vmem [shape: f32[1,128], index: 3, kind: input, shape index: {}]   ;;  %s1849_s4 = inlined_call_operand.hbm [shape: bf16[128,128], index: 4, kind: input, shape index: {}]   ;;  %s1850_s5 = inlined_call_operand.vmem [shape: f32[1,128], index: 5, kind: input, shape index: {}]   ;;  %s1851_s6 = inlined_call_operand.hbm [shape: f32[8,128], index: 6, kind: output, shape index: {}]  }
   0x1   :  { %12 = vsyncpa [#allocation7], 0 }
   0x2   :  { %13 = vsyncpa [#allocation10], 0 }
   0x3   :  { %14 = vsyncpa [#allocation5], 0  ;;  %s1450_s21 = smov [#allocation6]   ;;  %s1451_s23 = smov [#allocation3]  }
   0x4   :  { %s32_s22 = sshll.u32 %s1450_s21, 4  ;;  %s20_s24 = sshll.u32 %s1451_s23, 4  ;;  %s33_s22 = int_to_ptr.vmem [resolvable:$true] %s32_s22  ;;  %s1498_s24 = int_to_ptr.vmem [resolvable:$true] %s20_s24 }
   0x5   :  { %s1332_s27 = scalar_lea.hbm %s1846_s1, 1024 }
   0x6   :  { %p1333_p0 = scmp.ne.s32.totalorder %s1846_s1, %s1332_s27  ;;  %p1336_p1 = scmp.lt.u32.totalorder %s1332_s27, %s1846_s1 }
   0x8   :  { %p1338_p2 = pnand %p1336_p1, %p1333_p0 }
   0xa   :  { %1341 = shalt.err (!%p1338_p2)
}
   0xb   :  { %s1342_s8 = scalar_lea.vmem %s33_s22, 1024  ;;  %p1347_p4 = scmp.lt.s32.totalorder %s33_s22, %s33_s22 }
   0xc   :  { %p1343_p3 = scmp.ne.s32.totalorder %s33_s22, %s1342_s8  ;;  %p1348_p5 = scmp.lt.s32.totalorder %s1342_s8, %s1342_s8 }
   0xe   :  { %p1349_p6 = por %p1348_p5, %p1347_p4 }
  0x10   :  { %p1350_p7 = pnand %p1349_p6, %p1343_p3 }
  0x12   :  { %1353 = shalt.err (!%p1350_p7)
}
  0x13   :  { %s1452_s9 = smov 64   ;;  %s1453_s10 = smov 4  }
  0x14   :  { %38 = dma.hbm_to_vmem [thread:$0]  %s1846_s1, 1024, %s33_s22, [#allocation7], %s1452_s9, %s1452_s9, %s1453_s10  }
  0x15   :  { %s1354_s15 = scalar_lea.hbm %s1845_s0, 512 }
  0x16   :  { %p1355_p8 = scmp.ne.s32.totalorder %s1845_s0, %s1354_s15  ;;  %p1358_p9 = scmp.lt.u32.totalorder %s1354_s15, %s1845_s0 }
  0x18   :  { %p1360_p10 = pnand %p1358_p9, %p1355_p8 }
  0x1a   :  { %1363 = shalt.err (!%p1360_p10)
}
  0x1b   :  { %s1364_s20 = scalar_lea.vmem %s1498_s24, 512  ;;  %p1369_p12 = scmp.lt.s32.totalorder %s1498_s24, %s1498_s24 }
  0x1c   :  { %p1365_p11 = scmp.ne.s32.totalorder %s1498_s24, %s1364_s20  ;;  %p1370_p13 = scmp.lt.s32.totalorder %s1364_s20, %s1364_s20 }
  0x1e   :  { %p1371_p0 = por %p1370_p13, %p1369_p12 }
  0x20   :  { %p1372_p1 = pnand %p1371_p0, %p1365_p11 }
  0x22   :  { %1375 = shalt.err (!%p1372_p1)
}
  0x23   :  { %26 = dma.hbm_to_vmem [thread:$0]  %s1845_s0, 512, %s1498_s24, [#allocation4], %s1452_s9, %s1452_s9, %s1453_s10  }
  0x24   :  { %s1454_s22 = smov [#allocation8]   ;;  %s1455_s25 = smov [#allocation9]  }
  0x25   :  { %s44_s23 = sshll.u32 %s1454_s22, 4  ;;  %s58_s26 = sshll.u32 %s1455_s25, 4  ;;  %s45_s23 = int_to_ptr.vmem [resolvable:$true] %s44_s23  ;;  %s1535_s26 = int_to_ptr.vmem [resolvable:$true] %s58_s26 }
  0x26   :  { %s1376_s29 = scalar_lea.hbm %s1847_s2, 1024 }
  0x27   :  { %p1377_p2 = scmp.ne.s32.totalorder %s1847_s2, %s1376_s29  ;;  %p1380_p3 = scmp.lt.u32.totalorder %s1376_s29, %s1847_s2 }
  0x29   :  { %p1382_p4 = pnand %p1380_p3, %p1377_p2 }
  0x2b   :  { %1385 = shalt.err (!%p1382_p4)
}
  0x2c   :  { %s1386_s0 = scalar_lea.vmem %s45_s23, 1024  ;;  %p1391_p6 = scmp.lt.s32.totalorder %s45_s23, %s45_s23 }
  0x2d   :  { %p1387_p5 = scmp.ne.s32.totalorder %s45_s23, %s1386_s0  ;;  %p1392_p7 = scmp.lt.s32.totalorder %s1386_s0, %s1386_s0 }
  0x2f   :  { %p1393_p8 = por %p1392_p7, %p1391_p6 }
  0x31   :  { %p1394_p9 = pnand %p1393_p8, %p1387_p5 }
  0x33   :  { %1397 = shalt.err (!%p1394_p9)
}
  0x34   :  { %50 = dma.hbm_to_vmem [thread:$0]  %s1847_s2, 1024, %s45_s23, [#allocation7], %s1452_s9, %s1452_s9, %s1453_s10  }
  0x35   :  { %s1398_s15 = scalar_lea.hbm %s1849_s4, 1024 }
  0x36   :  { %p1399_p10 = scmp.ne.s32.totalorder %s1849_s4, %s1398_s15  ;;  %p1402_p11 = scmp.lt.u32.totalorder %s1398_s15, %s1849_s4 }
  0x38   :  { %p1404_p12 = pnand %p1402_p11, %p1399_p10 }
  0x3a   :  { %1407 = shalt.err (!%p1404_p12)
}
  0x3b   :  { %s1408_s20 = scalar_lea.vmem %s1535_s26, 1024  ;;  %p1413_p0 = scmp.lt.s32.totalorder %s1535_s26, %s1535_s26 }
  0x3c   :  { %p1409_p13 = scmp.ne.s32.totalorder %s1535_s26, %s1408_s20  ;;  %p1414_p1 = scmp.lt.s32.totalorder %s1408_s20, %s1408_s20 }
  0x3e   :  { %p1415_p2 = por %p1414_p1, %p1413_p0 }
  0x40   :  { %p1416_p3 = pnand %p1415_p2, %p1409_p13 }
  0x42   :  { %1419 = shalt.err (!%p1416_p3)
}
  0x43   :  { %64 = dma.hbm_to_vmem [thread:$0]  %s1849_s4, 1024, %s1535_s26, [#allocation10], %s1452_s9, %s1452_s9, %s1453_s10  }
  0x44   :  { %1442 = dma.done.wait [#allocation4], 512  }
  0x45   :  { %1443 = vsyncadd [#allocation4], 4294966784 }
  0x46   :  { %1444 = dma.done.wait [#allocation7], 2048  }
  0x47   :  { %1445 = vsyncadd [#allocation7], 4294965248 }
  0x48   :  { %1446 = dma.done.wait [#allocation10], 1024  }
  0x49   :  { %1447 = vsyncadd [#allocation10], 4294966272  ;;  %v1456_v0 = vmov 0.0   ;;  %vm1457_vm0 = vmmov 0   ;;  %v1272_v1 = vld [vmem:[#allocation6] sm:$0xff]   ;;  %v1274_v3 = vld [vmem:[#allocation6 + $0x8] sm:$0xff]   ;;  %v272_v20 = vlaneseq }
  0x4a   :  { %1079 = vmatprep.subr.bf16.mxu1 %v1456_v0  ;;  %1095 = vmatprep.mubr.msk.bf16.mxu1 %vm1457_vm0, %v1456_v0  ;;  %v1575_v2 = vld [vmem:[#allocation8] sm:$0xff]   ;;  %v1578_v4 = vld [vmem:[#allocation8 + $0x8] sm:$0xff]   ;;  %v1276_v5 = vld [vmem:[#allocation6 + $0x10] sm:$0xff]   ;;  %v1458_v19 = vmov 0   ;;  %v1459_v30 = vmov 0.5   ;;  %s1461_s21 = smov 96  }
  0x4b   :  { %1055 = vmatprep.subr.bf16.mxu0 %v1272_v1  ;;  %1080 = vmatpush3.bf16.msra.mxu1 %v1575_v2  ;;  %v1582_v6 = vld [vmem:[#allocation8 + $0x10] sm:$0xff]   ;;  %v1278_v7 = vld [vmem:[#allocation6 + $0x18] sm:$0xff]   ;;  %v1280_v9 = vld [vmem:[#allocation6 + $0x20] sm:$0xff]   ;;  %v1642_v21 = vand.u32 127, %v272_v20  ;;  %s1462_s23 = smov [#allocation11]  }
  0x4c   :  { %1056 = vmatpush3.bf16.msra.mxu0 %v1272_v1  ;;  %1081 = vmatprep.subr.bf16.mxu1 %v1456_v0  ;;  %v1586_v8 = vld [vmem:[#allocation8 + $0x18] sm:$0xff]   ;;  %v1589_v10 = vld [vmem:[#allocation8 + $0x20] sm:$0xff]   ;;  %v1282_v11 = vld [vmem:[#allocation6 + $0x28] sm:$0xff]   ;;  %s918_s25 = sshll.u32 %s1462_s23, 4  ;;  %s919_s25 = int_to_ptr.vmem [resolvable:$true] %s918_s25 }
  0x4d   :  { %1057 = vmatprep.subr.bf16.mxu0 %v1274_v3  ;;  %v1288_v12 = vld [vmem:[#allocation3] sm:$0xff]   ;;  %v1593_v13 = vld [vmem:[#allocation8 + $0x28] sm:$0xff]   ;;  %v1284_v14 = vld [vmem:[#allocation6 + $0x30] sm:$0xff]   ;;  %vm274_vm1 = vcmp.ge.s32.totalorder %v1642_v21, 64  ;;  %vm275_vm2 = vcmp.lt.s32.totalorder %v1642_v21, 96  ;;  %vm797_vm4 = vcmp.lt.s32.totalorder %v1642_v21, 32  ;;  %p1425_p5 = scmp.lt.s32.totalorder %s919_s25, %s919_s25 }
  0x4e   :  { %1071 = vmatprep.mubr.bf16.mxu0 %v1288_v12  ;;  %v1597_v15 = vld [vmem:[#allocation8 + $0x30] sm:$0xff]   ;;  %v1286_v16 = vld [vmem:[#allocation6 + $0x38] sm:$0xff]   ;;  %v1289_v18 = vld [vmem:[#allocation3 + $0x8] sm:$0xff]   ;;  %s1420_s26 = scalar_lea.vmem %s919_s25, 128 }
  0x4f   :  { %1082 = vmatpush3.bf16.msra.mxu1 %v1578_v4  ;;  %v1602_v17 = vld [vmem:[#allocation8 + $0x38] sm:$0xff]   ;;  %v1649_v22 = vld [vmem:[%s1848_s3] ss:$0 sm:$0xff]  ;;  %vm276_vm3 = vmand %vm274_vm1, %vm275_vm2  ;;  %s1460_s3 = smov 32   ;;  %p1421_p4 = scmp.ne.s32.totalorder %s919_s25, %s1420_s26 }
  0x50   :  { %1058 = vmatpush3.bf16.msra.mxu0 %v1274_v3  ;;  %1083 = vmatprep.subr.bf16.mxu1 %v1456_v0  ;;  %v1656_v31 = vsel %vm276_vm3, 1.0, %v1459_v30  ;;  %v1659_v37 = vsel %vm276_vm3, 0.0, %v1459_v30  ;;  %v1290_v38 = vld [vmem:[#allocation3 + $0x10] sm:$0xff]   ;;  %v1291_v39 = vld [vmem:[#allocation3 + $0x18] sm:$0xff]   ;;  %vm959_vm5 = vmpackc.low %vm797_vm4, %vm797_vm4  ;;  %p1426_p6 = scmp.lt.s32.totalorder %s1420_s26, %s1420_s26 }
  0x51   :  { %1059 = vmatprep.subr.bf16.mxu0 %v1276_v5 }
  0x52   :  { %p1427_p7 = por %p1426_p6, %p1425_p5 }
  0x53   :  { %1084 = vmatpush3.bf16.msra.mxu1 %v1582_v6 }
  0x54   :  { %1060 = vmatpush3.bf16.msra.mxu0 %v1276_v5  ;;  %1085 = vmatprep.subr.bf16.mxu1 %v1456_v0  ;;  %p1428_p8 = pnand %p1427_p7, %p1421_p4 }
  0x55   :  { %1061 = vmatprep.subr.bf16.mxu0 %v1278_v7 }
  0x57   :  { %1086 = vmatpush3.bf16.msra.mxu1 %v1586_v8 }
  0x58   :  { %1062 = vmatpush3.bf16.msra.mxu0 %v1278_v7  ;;  %1087 = vmatprep.subr.bf16.mxu1 %v1456_v0 }
  0x59   :  { %1063 = vmatprep.subr.bf16.mxu0 %v1280_v9 }
  0x5b   :  { %1088 = vmatpush3.bf16.msra.mxu1 %v1589_v10 }
  0x5c   :  { %1064 = vmatpush3.bf16.msra.mxu0 %v1280_v9  ;;  %1089 = vmatprep.subr.bf16.mxu1 %v1456_v0 }
  0x5d   :  { %1065 = vmatprep.subr.bf16.mxu0 %v1282_v11 }
  0x5f   :  { %1090 = vmatpush3.bf16.msra.mxu1 %v1593_v13 }
  0x60   :  { %1066 = vmatpush3.bf16.msra.mxu0 %v1282_v11  ;;  %1091 = vmatprep.subr.bf16.mxu1 %v1456_v0 }
  0x61   :  { %1067 = vmatprep.subr.bf16.mxu0 %v1284_v14 }
  0x63   :  { %1092 = vmatpush3.bf16.msra.mxu1 %v1597_v15 }
  0x64   :  { %1068 = vmatpush3.bf16.msra.mxu0 %v1284_v14  ;;  %1093 = vmatprep.subr.bf16.mxu1 %v1456_v0 }
  0x65   :  { %1069 = vmatprep.subr.bf16.mxu0 %v1286_v16 }
  0x67   :  { %1094 = vmatpush3.bf16.msra.mxu1 %v1602_v17 }
  0x68   :  { %1070 = vmatpush3.bf16.msra.mxu0 %v1286_v16  ;;  %1119 = vmatprep.subr.bf16.mxu1 %v1456_v0 }
  0x69   :  { %1099 = vmatprep.subr.bf16.mxu0 %v1456_v0 }
  0x6a   :  { %1096 = vmatmul.mubr.bf16.vlgmr.msra.gmra.mrb[0].mxu1 %v1458_v19 }
  0x6b   :  { %1072 = vmatmul.mubr.bf16.vlgmr.msra.gmra.mrb[0].mxu0 %v1289_v18  ;;  %1120 = vmatpush3.bf16.msra.mxu1 %v1575_v2 }
  0x6c   :  { %1100 = vmatpush3.bf16.msra.mxu0 %v1575_v2  ;;  %1121 = vmatprep.subr.bf16.mxu1 %v1456_v0 }
  0x6d   :  { %1101 = vmatprep.subr.bf16.mxu0 %v1456_v0  ;;  %1135 = vmatprep.mubr.msk.bf16.mxu1 %vm1457_vm0, %v1456_v0 }
  0x6e   :  { %1075 = vmatprep.mubr.bf16.mxu0 %v1290_v38 }
  0x6f   :  { %1122 = vmatpush3.bf16.msra.mxu1 %v1578_v4 }
  0x70   :  { %1102 = vmatpush3.bf16.msra.mxu0 %v1578_v4  ;;  %1123 = vmatprep.subr.bf16.mxu1 %v1456_v0 }
  0x71   :  { %1103 = vmatprep.subr.bf16.mxu0 %v1456_v0 }
  0x73   :  { %1124 = vmatpush3.bf16.msra.mxu1 %v1582_v6  ;;  %1076 = vmatmul.mubr.bf16.gmra.mrb[4].mxu0 %v1291_v39 }
  0x74   :  { %1104 = vmatpush3.bf16.msra.mxu0 %v1582_v6  ;;  %1125 = vmatprep.subr.bf16.mxu1 %v1456_v0 }
  0x75   :  { %1105 = vmatprep.subr.bf16.mxu0 %v1456_v0  ;;  %1115 = vmatprep.mubr.msk.bf16.mxu0 %vm1457_vm0, %v1456_v0 }
  0x77   :  { %1126 = vmatpush3.bf16.msra.mxu1 %v1586_v8 }
  0x78   :  { %1106 = vmatpush3.bf16.msra.mxu0 %v1586_v8  ;;  %1127 = vmatprep.subr.bf16.mxu1 %v1456_v0 }
  0x79   :  { %1107 = vmatprep.subr.bf16.mxu0 %v1456_v0 }
  0x7b   :  { %1128 = vmatpush3.bf16.msra.mxu1 %v1589_v10 }
  0x7c   :  { %1108 = vmatpush3.bf16.msra.mxu0 %v1589_v10  ;;  %1129 = vmatprep.subr.bf16.mxu1 %v1456_v0 }
  0x7d   :  { %1109 = vmatprep.subr.bf16.mxu0 %v1456_v0 }
  0x7f   :  { %1130 = vmatpush3.bf16.msra.mxu1 %v1593_v13 }
  0x80   :  { %1110 = vmatpush3.bf16.msra.mxu0 %v1593_v13  ;;  %1131 = vmatprep.subr.bf16.mxu1 %v1456_v0 }
  0x81   :  { %1111 = vmatprep.subr.bf16.mxu0 %v1456_v0 }
  0x83   :  { %1132 = vmatpush3.bf16.msra.mxu1 %v1597_v15 }
  0x84   :  { %1112 = vmatpush3.bf16.msra.mxu0 %v1597_v15  ;;  %1133 = vmatprep.subr.bf16.mxu1 %v1456_v0 }
  0x85   :  { %1113 = vmatprep.subr.bf16.mxu0 %v1456_v0 }
  0x87   :  { %1134 = vmatpush3.bf16.msra.mxu1 %v1602_v17 }
  0x88   :  { %1114 = vmatpush3.bf16.msra.mxu0 %v1602_v17  ;;  %1159 = vmatprep.subr.bf16.mxu1 %v1456_v0 }
  0x89   :  { %1139 = vmatprep.subr.bf16.mxu0 %v1456_v0 }
 0x13d   :  { %v362_v24 = vpop.f32.mrb[0].mxu1 }
 0x13e   :  { %v1651_v23 = vpop.f32.mrb[0].mxu0  ;;  %v1097_v26 = vpop.f32.mrb[1].mxu1 }
 0x13f   :  { %v217_v25 = vpop.f32.mrb[1].mxu0  ;;  %v365_v29 = vpop.f32.mrb[2].mxu1  ;;  %v226_v19 = vadd.f32 %v1651_v23, %v1649_v22 }
 0x140   :  { %v218_v27 = vadd.f32 %v1649_v22, %v217_v25  ;;  %v1654_v28 = vpop.f32.mrb[2].mxu0  ;;  %v1098_v33 = vpop.f32.mrb[3].mxu1 }
 0x141   :  { %v220_v32 = vpop.f32.mrb[3].mxu0 }
 0x142   :  { %v368_v34 = vadd.f32 %v362_v24, %v218_v27  ;;  %v221_v55 = vadd.f32 %v1649_v22, %v220_v32 }
 0x144   :  { %v369_v35 = vmul.f32 %v368_v34, %v1656_v31 }
 0x146   :  { %1300 = vtanh.f32 %v369_v35  ;;  %v1686_v51 = vpop.f32.mrb[4].mxu0 }
 0x147   :  { %v1688_v52 = vpop.f32.mrb[5].mxu0 }
 0x148   :  { %v1690_v53 = vpop.f32.mrb[6].mxu0 }
 0x149   :  { %v1692_v54 = vpop.f32.mrb[7].mxu0 }
 0x150   :  { %v1301_v36 = vpop.eup %1300 }
 0x151   :  { %v371_v40 = vmul.f32 %v1301_v36, %v1656_v31 }
 0x153   :  { %v372_v41 = vadd.f32 %v371_v40, %v1659_v37 }
 0x155   :  { %377 = vrot.lane.b32.xlu1 %v372_v41, %s1460_s3  ;;  %373 = vrot.lane.b32.xlu0 %v372_v41, %s1461_s21 }
 0x159   :  { %375 = vrot.lane.b32.xlu0 %v372_v41, %s1452_s9 }
 0x1c7   :  { %v374_v42 = vpop.permute.xlu0 %373  ;;  %v378_v48 = vpop.permute.xlu1 %377 }
 0x1c8   :  { %v379_v44 = vmul.f32 0.0, %v374_v42 }
 0x1cb   :  { %v376_v43 = vpop.permute.xlu0 %375 }
 0x1cc   :  { %v380_v45 = vmul.f32 %v376_v43, %v372_v41  ;;  %v229_v43 = vadd.f32 %v1654_v28, %v1649_v22 }
 0x1ce   :  { %v381_v46 = vadd.f32 %v380_v45, %v379_v44 }
 0x1d0   :  { %1302 = vtanh.f32 %v381_v46 }
 0x1da   :  { %v1303_v47 = vpop.eup %1302 }
 0x1db   :  { %v383_v49 = vmul.f32 %v1303_v47, %v378_v48 }
 0x1dd   :  { %v386_v50 = vpack.c.bf16 %v383_v49, %v383_v49 }
 0x1df   :  { %1116 = vmatmul.mubr.bf16.vlgmr.msra.gmra.mrb[8].mxu0 %v386_v50 }
 0x1e0   :  { %1140 = vmatpush3.bf16.msra.mxu0 %v1575_v2  ;;  %1155 = vmatprep.mubr.msk.bf16.mxu0 %vm1457_vm0, %v1456_v0 }
 0x1e1   :  { %1141 = vmatprep.subr.bf16.mxu0 %v1456_v0 }
 0x1e4   :  { %1142 = vmatpush3.bf16.msra.mxu0 %v1578_v4 }
 0x1e5   :  { %1143 = vmatprep.subr.bf16.mxu0 %v1456_v0 }
 0x1e8   :  { %1144 = vmatpush3.bf16.msra.mxu0 %v1582_v6 }
 0x1e9   :  { %1145 = vmatprep.subr.bf16.mxu0 %v1456_v0 }
 0x1ec   :  { %1146 = vmatpush3.bf16.msra.mxu0 %v1586_v8 }
 0x1ed   :  { %1147 = vmatprep.subr.bf16.mxu0 %v1456_v0 }
 0x1f0   :  { %1148 = vmatpush3.bf16.msra.mxu0 %v1589_v10 }
 0x1f1   :  { %1149 = vmatprep.subr.bf16.mxu0 %v1456_v0 }
 0x1f4   :  { %1150 = vmatpush3.bf16.msra.mxu0 %v1593_v13 }
 0x1f5   :  { %1151 = vmatprep.subr.bf16.mxu0 %v1456_v0 }
 0x1f8   :  { %1152 = vmatpush3.bf16.msra.mxu0 %v1597_v15 }
 0x1f9   :  { %1153 = vmatprep.subr.bf16.mxu0 %v1456_v0 }
 0x1fc   :  { %1154 = vmatpush3.bf16.msra.mxu0 %v1602_v17 }
 0x1fd   :  { %1179 = vmatprep.subr.bf16.mxu0 %v1456_v0 }
 0x2b2   :  { %v421_v56 = vpop.f32.mrb[8].mxu0 }
 0x2b3   :  { %v427_v57 = vadd.f32 %v421_v56, %v221_v55  ;;  %v1117_v58 = vpop.f32.mrb[9].mxu0 }
 0x2b4   :  { %v424_v59 = vpop.f32.mrb[10].mxu0 }
 0x2b5   :  { %v428_v60 = vmul.f32 %v427_v57, %v1656_v31  ;;  %v1118_v61 = vpop.f32.mrb[11].mxu0 }
 0x2b7   :  { %1304 = vtanh.f32 %v428_v60 }
 0x2c1   :  { %v1305_v62 = vpop.eup %1304 }
 0x2c2   :  { %v430_v63 = vmul.f32 %v1305_v62, %v1656_v31 }
 0x2c4   :  { %v431_v1 = vadd.f32 %v430_v63, %v1659_v37 }
 0x2c6   :  { %434 = vrot.lane.b32.xlu0 %v431_v1, %s1452_s9  ;;  %432 = vrot.lane.b32.xlu1 %v431_v1, %s1461_s21 }
 0x2ca   :  { %436 = vrot.lane.b32.xlu1 %v431_v1, %s1460_s3 }
 0x338   :  { %v435_v3 = vpop.permute.xlu0 %434  ;;  %v433_v5 = vpop.permute.xlu1 %432 }
 0x339   :  { %v439_v7 = vmul.f32 %v435_v3, %v431_v1  ;;  %v438_v9 = vmul.f32 %v433_v5, %v381_v46  ;;  %v234_v3 = vadd.f32 %v1649_v22, %v1688_v52 }
 0x33b   :  { %v440_v11 = vadd.f32 %v439_v7, %v438_v9 }
 0x33c   :  { %v437_v14 = vpop.permute.xlu1 %436 }
 0x33d   :  { %1306 = vtanh.f32 %v440_v11 }
 0x347   :  { %v1307_v12 = vpop.eup %1306 }
 0x348   :  { %v442_v16 = vmul.f32 %v1307_v12, %v437_v14 }
 0x34a   :  { %v445_v18 = vpack.c.bf16 %v442_v16, %v442_v16 }
 0x34c   :  { %1136 = vmatmul.mubr.bf16.vlgmr.msra.gmra.mrb[4].mxu1 %v445_v18 }
 0x34d   :  { %1160 = vmatpush3.bf16.msra.mxu1 %v1575_v2  ;;  %1175 = vmatprep.mubr.msk.bf16.mxu1 %vm1457_vm0, %v1456_v0 }
 0x34e   :  { %1161 = vmatprep.subr.bf16.mxu1 %v1456_v0 }
 0x351   :  { %1162 = vmatpush3.bf16.msra.mxu1 %v1578_v4 }
 0x352   :  { %1163 = vmatprep.subr.bf16.mxu1 %v1456_v0 }
 0x355   :  { %1164 = vmatpush3.bf16.msra.mxu1 %v1582_v6 }
 0x356   :  { %1165 = vmatprep.subr.bf16.mxu1 %v1456_v0 }
 0x359   :  { %1166 = vmatpush3.bf16.msra.mxu1 %v1586_v8 }
 0x35a   :  { %1167 = vmatprep.subr.bf16.mxu1 %v1456_v0 }
 0x35d   :  { %1168 = vmatpush3.bf16.msra.mxu1 %v1589_v10 }
 0x35e   :  { %1169 = vmatprep.subr.bf16.mxu1 %v1456_v0 }
 0x361   :  { %1170 = vmatpush3.bf16.msra.mxu1 %v1593_v13 }
 0x362   :  { %1171 = vmatprep.subr.bf16.mxu1 %v1456_v0 }
 0x365   :  { %1172 = vmatpush3.bf16.msra.mxu1 %v1597_v15 }
 0x366   :  { %1173 = vmatprep.subr.bf16.mxu1 %v1456_v0 }
 0x369   :  { %1174 = vmatpush3.bf16.msra.mxu1 %v1602_v17 }
 0x36a   :  { %1199 = vmatprep.subr.bf16.mxu1 %v1456_v0 }
 0x41f   :  { %v480_v20 = vpop.f32.mrb[4].mxu1 }
 0x420   :  { %v486_v24 = vadd.f32 %v480_v20, %v226_v19  ;;  %v1137_v25 = vpop.f32.mrb[5].mxu1 }
 0x421   :  { %v483_v26 = vpop.f32.mrb[6].mxu1 }
 0x422   :  { %v487_v27 = vmul.f32 %v486_v24, %v1656_v31  ;;  %v1138_v29 = vpop.f32.mrb[7].mxu1 }
 0x424   :  { %1308 = vtanh.f32 %v487_v27 }
 0x42e   :  { %v1309_v30 = vpop.eup %1308 }
 0x42f   :  { %v489_v32 = vmul.f32 %v1309_v30, %v1656_v31 }
 0x431   :  { %v490_v33 = vadd.f32 %v489_v32, %v1659_v37 }
 0x433   :  { %493 = vrot.lane.b32.xlu1 %v490_v33, %s1452_s9  ;;  %491 = vrot.lane.b32.xlu0 %v490_v33, %s1461_s21 }
 0x437   :  { %495 = vrot.lane.b32.xlu0 %v490_v33, %s1460_s3 }
 0x4a5   :  { %v494_v23 = vpop.permute.xlu1 %493  ;;  %v492_v34 = vpop.permute.xlu0 %491 }
 0x4a6   :  { %v498_v35 = vmul.f32 %v494_v23, %v490_v33  ;;  %v497_v36 = vmul.f32 %v492_v34, %v440_v11 }
 0x4a8   :  { %v499_v38 = vadd.f32 %v498_v35, %v497_v36 }
 0x4a9   :  { %v496_v40 = vpop.permute.xlu0 %495 }
 0x4aa   :  { %1310 = vtanh.f32 %v499_v38 }
 0x4b4   :  { %v1311_v39 = vpop.eup %1310 }
 0x4b5   :  { %v501_v41 = vmul.f32 %v1311_v39, %v496_v40 }
 0x4b7   :  { %v504_v42 = vpack.c.bf16 %v501_v41, %v501_v41 }
 0x4b9   :  { %1156 = vmatmul.mubr.bf16.vlgmr.msra.gmra.mrb[12].mxu0 %v504_v42 }
 0x4ba   :  { %1180 = vmatpush3.bf16.msra.mxu0 %v1575_v2  ;;  %1195 = vmatprep.mubr.msk.bf16.mxu0 %vm1457_vm0, %v1456_v0 }
 0x4bb   :  { %1181 = vmatprep.subr.bf16.mxu0 %v1456_v0 }
 0x4be   :  { %1182 = vmatpush3.bf16.msra.mxu0 %v1578_v4 }
 0x4bf   :  { %1183 = vmatprep.subr.bf16.mxu0 %v1456_v0 }
 0x4c2   :  { %1184 = vmatpush3.bf16.msra.mxu0 %v1582_v6 }
 0x4c3   :  { %1185 = vmatprep.subr.bf16.mxu0 %v1456_v0 }
 0x4c6   :  { %1186 = vmatpush3.bf16.msra.mxu0 %v1586_v8 }
 0x4c7   :  { %1187 = vmatprep.subr.bf16.mxu0 %v1456_v0 }
 0x4ca   :  { %1188 = vmatpush3.bf16.msra.mxu0 %v1589_v10 }
 0x4cb   :  { %1189 = vmatprep.subr.bf16.mxu0 %v1456_v0 }
 0x4ce   :  { %1190 = vmatpush3.bf16.msra.mxu0 %v1593_v13 }
 0x4cf   :  { %1191 = vmatprep.subr.bf16.mxu0 %v1456_v0 }
 0x4d2   :  { %1192 = vmatpush3.bf16.msra.mxu0 %v1597_v15 }
 0x4d3   :  { %1193 = vmatprep.subr.bf16.mxu0 %v1456_v0 }
 0x4d6   :  { %1194 = vmatpush3.bf16.msra.mxu0 %v1602_v17 }
 0x4d7   :  { %1219 = vmatprep.subr.bf16.mxu0 %v1456_v0 }
 0x58c   :  { %v539_v44 = vpop.f32.mrb[12].mxu0 }
 0x58d   :  { %v545_v45 = vadd.f32 %v539_v44, %v229_v43  ;;  %v1157_v46 = vpop.f32.mrb[13].mxu0  ;;  %v242_v43 = vadd.f32 %v1686_v51, %v1649_v22 }
 0x58e   :  { %v542_v47 = vpop.f32.mrb[14].mxu0 }
 0x58f   :  { %v546_v48 = vmul.f32 %v545_v45, %v1656_v31  ;;  %v1158_v49 = vpop.f32.mrb[15].mxu0 }
 0x591   :  { %1312 = vtanh.f32 %v546_v48 }
 0x59b   :  { %v1313_v50 = vpop.eup %1312 }
 0x59c   :  { %v548_v55 = vmul.f32 %v1313_v50, %v1656_v31 }
 0x59e   :  { %v549_v56 = vadd.f32 %v548_v55, %v1659_v37 }
 0x5a0   :  { %552 = vrot.lane.b32.xlu0 %v549_v56, %s1452_s9  ;;  %550 = vrot.lane.b32.xlu1 %v549_v56, %s1461_s21 }
 0x5a4   :  { %554 = vrot.lane.b32.xlu1 %v549_v56, %s1460_s3 }
 0x612   :  { %v553_v28 = vpop.permute.xlu0 %552  ;;  %v551_v57 = vpop.permute.xlu1 %550 }
 0x613   :  { %v557_v58 = vmul.f32 %v553_v28, %v549_v56  ;;  %v556_v59 = vmul.f32 %v551_v57, %v499_v38 }
 0x615   :  { %v558_v60 = vadd.f32 %v557_v58, %v556_v59 }
 0x616   :  { %v555_v62 = vpop.permute.xlu1 %554 }
 0x617   :  { %1314 = vtanh.f32 %v558_v60 }
 0x621   :  { %v1315_v61 = vpop.eup %1314 }
 0x622   :  { %v560_v63 = vmul.f32 %v1315_v61, %v555_v62 }
 0x624   :  { %v563_v1 = vpack.c.bf16 %v560_v63, %v560_v63 }
 0x626   :  { %1176 = vmatmul.mubr.bf16.vlgmr.msra.gmra.mrb[8].mxu1 %v563_v1  ;;  %v1292_v1 = vld [vmem:[#allocation9] sm:$0xff]  }
 0x627   :  { %1200 = vmatpush3.bf16.msra.mxu1 %v1575_v2  ;;  %1215 = vmatprep.mubr.msk.bf16.mxu1 %vm1457_vm0, %v1456_v0 }
 0x628   :  { %1201 = vmatprep.subr.bf16.mxu1 %v1456_v0 }
 0x62b   :  { %1202 = vmatpush3.bf16.msra.mxu1 %v1578_v4 }
 0x62c   :  { %1203 = vmatprep.subr.bf16.mxu1 %v1456_v0 }
 0x62f   :  { %1204 = vmatpush3.bf16.msra.mxu1 %v1582_v6 }
 0x630   :  { %1205 = vmatprep.subr.bf16.mxu1 %v1456_v0 }
 0x633   :  { %1206 = vmatpush3.bf16.msra.mxu1 %v1586_v8 }
 0x634   :  { %1207 = vmatprep.subr.bf16.mxu1 %v1456_v0 }
 0x637   :  { %1208 = vmatpush3.bf16.msra.mxu1 %v1589_v10 }
 0x638   :  { %1209 = vmatprep.subr.bf16.mxu1 %v1456_v0 }
 0x63b   :  { %1210 = vmatpush3.bf16.msra.mxu1 %v1593_v13 }
 0x63c   :  { %1211 = vmatprep.subr.bf16.mxu1 %v1456_v0 }
 0x63f   :  { %1212 = vmatpush3.bf16.msra.mxu1 %v1597_v15 }
 0x640   :  { %1213 = vmatprep.subr.bf16.mxu1 %v1456_v0 }
 0x643   :  { %1214 = vmatpush3.bf16.msra.mxu1 %v1602_v17 }
 0x644   :  { %1239 = vmatprep.subr.bf16.mxu1 %v1456_v0 }
 0x6f9   :  { %v598_v5 = vpop.f32.mrb[8].mxu1 }
 0x6fa   :  { %v604_v7 = vadd.f32 %v598_v5, %v234_v3  ;;  %v1177_v9 = vpop.f32.mrb[9].mxu1  ;;  %v1293_v3 = vld [vmem:[#allocation9 + $0x8] sm:$0xff]   ;;  %v1294_v5 = vld [vmem:[#allocation9 + $0x10] sm:$0xff]  }
 0x6fb   :  { %v601_v11 = vpop.f32.mrb[10].mxu1 }
 0x6fc   :  { %v605_v12 = vmul.f32 %v604_v7, %v1656_v31  ;;  %v1178_v14 = vpop.f32.mrb[11].mxu1  ;;  %v245_v7 = vadd.f32 %v1690_v53, %v1649_v22  ;;  %v1298_v53 = vld [vmem:[#allocation9 + $0x30] sm:$0xff]  }
 0x6fe   :  { %1316 = vtanh.f32 %v605_v12 }
 0x708   :  { %v1317_v16 = vpop.eup %1316 }
 0x709   :  { %v607_v18 = vmul.f32 %v1317_v16, %v1656_v31 }
 0x70b   :  { %v608_v19 = vadd.f32 %v607_v18, %v1659_v37 }
 0x70d   :  { %611 = vrot.lane.b32.xlu1 %v608_v19, %s1452_s9  ;;  %609 = vrot.lane.b32.xlu0 %v608_v19, %s1461_s21 }
 0x711   :  { %613 = vrot.lane.b32.xlu0 %v608_v19, %s1460_s3 }
 0x77f   :  { %v612_v52 = vpop.permute.xlu1 %611  ;;  %v610_v20 = vpop.permute.xlu0 %609 }
 0x780   :  { %v616_v24 = vmul.f32 %v612_v52, %v608_v19  ;;  %v615_v25 = vmul.f32 %v610_v20, %v558_v60  ;;  %v1295_v19 = vld [vmem:[#allocation9 + $0x18] sm:$0xff]   ;;  %v1296_v52 = vld [vmem:[#allocation9 + $0x20] sm:$0xff]   ;;  %v1297_v20 = vld [vmem:[#allocation9 + $0x28] sm:$0xff]  }
 0x782   :  { %v617_v26 = vadd.f32 %v616_v24, %v615_v25 }
 0x783   :  { %v614_v29 = vpop.permute.xlu0 %613 }
 0x784   :  { %1318 = vtanh.f32 %v617_v26 }
 0x78e   :  { %v1319_v27 = vpop.eup %1318 }
 0x78f   :  { %v619_v30 = vmul.f32 %v1319_v27, %v614_v29 }
 0x791   :  { %v622_v32 = vpack.c.bf16 %v619_v30, %v619_v30 }
 0x793   :  { %1196 = vmatmul.mubr.bf16.vlgmr.msra.gmra.mrb[16].mxu0 %v622_v32 }
 0x794   :  { %1220 = vmatpush3.bf16.msra.mxu0 %v1575_v2  ;;  %1235 = vmatprep.mubr.msk.bf16.mxu0 %vm1457_vm0, %v1456_v0  ;;  %v237_v2 = vadd.f32 %v1649_v22, %v1692_v54 }
 0x795   :  { %1221 = vmatprep.subr.bf16.mxu0 %v1456_v0 }
 0x798   :  { %1222 = vmatpush3.bf16.msra.mxu0 %v1578_v4 }
 0x799   :  { %1223 = vmatprep.subr.bf16.mxu0 %v1456_v0 }
 0x79c   :  { %1224 = vmatpush3.bf16.msra.mxu0 %v1582_v6 }
 0x79d   :  { %1225 = vmatprep.subr.bf16.mxu0 %v1456_v0 }
 0x7a0   :  { %1226 = vmatpush3.bf16.msra.mxu0 %v1586_v8 }
 0x7a1   :  { %1227 = vmatprep.subr.bf16.mxu0 %v1456_v0 }
 0x7a4   :  { %1228 = vmatpush3.bf16.msra.mxu0 %v1589_v10 }
 0x7a5   :  { %1229 = vmatprep.subr.bf16.mxu0 %v1456_v0 }
 0x7a8   :  { %1230 = vmatpush3.bf16.msra.mxu0 %v1593_v13 }
 0x7a9   :  { %1231 = vmatprep.subr.bf16.mxu0 %v1456_v0 }
 0x7ac   :  { %1232 = vmatpush3.bf16.msra.mxu0 %v1597_v15 }
 0x7ad   :  { %1233 = vmatprep.subr.bf16.mxu0 %v1456_v0 }
 0x7b0   :  { %1234 = vmatpush3.bf16.msra.mxu0 %v1602_v17 }
 0x866   :  { %v657_v4 = vpop.f32.mrb[16].mxu0 }
 0x867   :  { %v663_v6 = vadd.f32 %v657_v4, %v237_v2  ;;  %v1197_v8 = vpop.f32.mrb[17].mxu0 }
 0x868   :  { %v660_v33 = vpop.f32.mrb[18].mxu0 }
 0x869   :  { %v664_v10 = vmul.f32 %v663_v6, %v1656_v31  ;;  %v1198_v23 = vpop.f32.mrb[19].mxu0 }
 0x86b   :  { %1320 = vtanh.f32 %v664_v10 }
 0x875   :  { %v1321_v13 = vpop.eup %1320 }
 0x876   :  { %v666_v34 = vmul.f32 %v1321_v13, %v1656_v31 }
 0x878   :  { %v667_v15 = vadd.f32 %v666_v34, %v1659_v37 }
 0x87a   :  { %670 = vrot.lane.b32.xlu0 %v667_v15, %s1452_s9  ;;  %668 = vrot.lane.b32.xlu1 %v667_v15, %s1461_s21 }
 0x87e   :  { %672 = vrot.lane.b32.xlu1 %v667_v15, %s1460_s3 }
 0x8ec   :  { %v671_v17 = vpop.permute.xlu0 %670  ;;  %v669_v54 = vpop.permute.xlu1 %668 }
 0x8ed   :  { %v675_v35 = vmul.f32 %v671_v17, %v667_v15  ;;  %v674_v36 = vmul.f32 %v669_v54, %v617_v26  ;;  %v1299_v26 = vld [vmem:[#allocation9 + $0x38] sm:$0xff]  }
 0x8ef   :  { %v676_v38 = vadd.f32 %v675_v35, %v674_v36 }
 0x8f0   :  { %v673_v40 = vpop.permute.xlu1 %672 }
 0x8f1   :  { %1322 = vtanh.f32 %v676_v38 }
 0x8fb   :  { %v1323_v39 = vpop.eup %1322 }
 0x8fc   :  { %v678_v41 = vmul.f32 %v1323_v39, %v673_v40 }
 0x8fe   :  { %v681_v42 = vpack.c.bf16 %v678_v41, %v678_v41 }
 0x900   :  { %1216 = vmatmul.mubr.bf16.vlgmr.msra.gmra.mrb[12].mxu1 %v681_v42 }
 0x901   :  { %1255 = vmatprep.mubr.msk.bf16.mxu1 %vm1457_vm0, %v1456_v0  ;;  %1240 = vmatpush3.bf16.msra.mxu1 %v1292_v1 }
 0x902   :  { %1241 = vmatprep.subr.bf16.mxu1 %v1456_v0 }
 0x905   :  { %1242 = vmatpush3.bf16.msra.mxu1 %v1293_v3 }
 0x906   :  { %1243 = vmatprep.subr.bf16.mxu1 %v1456_v0 }
 0x909   :  { %1244 = vmatpush3.bf16.msra.mxu1 %v1294_v5 }
 0x90a   :  { %1245 = vmatprep.subr.bf16.mxu1 %v1456_v0 }
 0x90d   :  { %1246 = vmatpush3.bf16.msra.mxu1 %v1295_v19 }
 0x90e   :  { %1247 = vmatprep.subr.bf16.mxu1 %v1456_v0 }
 0x911   :  { %1248 = vmatpush3.bf16.msra.mxu1 %v1296_v52 }
 0x912   :  { %1249 = vmatprep.subr.bf16.mxu1 %v1456_v0 }
 0x915   :  { %1250 = vmatpush3.bf16.msra.mxu1 %v1297_v20 }
 0x916   :  { %1251 = vmatprep.subr.bf16.mxu1 %v1456_v0 }
 0x919   :  { %1252 = vmatpush3.bf16.msra.mxu1 %v1298_v53 }
 0x91a   :  { %1253 = vmatprep.subr.bf16.mxu1 %v1456_v0  ;;  %v950_v0 = vld [vmem:[%s1850_s5] ss:$0 sm:$0xff] }
 0x91d   :  { %1254 = vmatpush3.bf16.msra.mxu1 %v1299_v26 }
 0x9d3   :  { %v716_v44 = vpop.f32.mrb[12].mxu1 }
 0x9d4   :  { %v722_v45 = vadd.f32 %v716_v44, %v242_v43  ;;  %v1217_v46 = vpop.f32.mrb[13].mxu1 }
 0x9d5   :  { %v719_v47 = vpop.f32.mrb[14].mxu1 }
 0x9d6   :  { %v723_v48 = vmul.f32 %v722_v45, %v1656_v31  ;;  %v1218_v49 = vpop.f32.mrb[15].mxu1 }
 0x9d8   :  { %1324 = vtanh.f32 %v723_v48 }
 0x9e2   :  { %v1325_v50 = vpop.eup %1324 }
 0x9e3   :  { %v725_v55 = vmul.f32 %v1325_v50, %v1656_v31 }
 0x9e5   :  { %v726_v56 = vadd.f32 %v725_v55, %v1659_v37 }
 0x9e7   :  { %729 = vrot.lane.b32.xlu1 %v726_v56, %s1452_s9  ;;  %727 = vrot.lane.b32.xlu0 %v726_v56, %s1461_s21 }
 0x9eb   :  { %731 = vrot.lane.b32.xlu0 %v726_v56, %s1460_s3 }
 0xa59   :  { %v730_v51 = vpop.permute.xlu1 %729  ;;  %v728_v28 = vpop.permute.xlu0 %727 }
 0xa5a   :  { %v734_v57 = vmul.f32 %v730_v51, %v726_v56  ;;  %v733_v58 = vmul.f32 %v728_v28, %v676_v38 }
 0xa5c   :  { %v735_v59 = vadd.f32 %v734_v57, %v733_v58 }
 0xa5d   :  { %v732_v61 = vpop.permute.xlu0 %731 }
 0xa5e   :  { %1326 = vtanh.f32 %v735_v59 }
 0xa68   :  { %v1327_v60 = vpop.eup %1326 }
 0xa69   :  { %v737_v62 = vmul.f32 %v1327_v60, %v732_v61 }
 0xa6b   :  { %v740_v63 = vpack.c.bf16 %v737_v62, %v737_v62 }
 0xa6d   :  { %1236 = vmatmul.mubr.bf16.vlgmr.msra.gmra.mrb[20].mxu0 %v740_v63 }
 0xb40   :  { %v775_v9 = vpop.f32.mrb[20].mxu0 }
 0xb41   :  { %v781_v11 = vadd.f32 %v775_v9, %v245_v7  ;;  %v1237_v12 = vpop.f32.mrb[21].mxu0 }
 0xb42   :  { %v778_v14 = vpop.f32.mrb[22].mxu0 }
 0xb43   :  { %v782_v16 = vmul.f32 %v781_v11, %v1656_v31  ;;  %v1238_v18 = vpop.f32.mrb[23].mxu0 }
 0xb45   :  { %1328 = vtanh.f32 %v782_v16 }
 0xb4f   :  { %v1329_v24 = vpop.eup %1328 }
 0xb50   :  { %v784_v22 = vmul.f32 %v1329_v24, %v1656_v31 }
 0xb52   :  { %v785_v25 = vadd.f32 %v784_v22, %v1659_v37 }
 0xb54   :  { %788 = vrot.lane.b32.xlu0 %v785_v25, %s1452_s9  ;;  %786 = vrot.lane.b32.xlu1 %v785_v25, %s1461_s21 }
 0xb58   :  { %790 = vrot.lane.b32.xlu1 %v785_v25, %s1460_s3 }
 0xbc6   :  { %v789_v27 = vpop.permute.xlu0 %788  ;;  %v787_v29 = vpop.permute.xlu1 %786 }
 0xbc7   :  { %v793_v30 = vmul.f32 %v789_v27, %v785_v25  ;;  %v792_v31 = vmul.f32 %v787_v29, %v735_v59 }
 0xbc9   :  { %v794_v32 = vadd.f32 %v793_v30, %v792_v31 }
 0xbca   :  { %v791_v2 = vpop.permute.xlu1 %790 }
 0xbcb   :  { %1330 = vtanh.f32 %v794_v32 }
 0xbd5   :  { %v1331_v37 = vpop.eup %1330 }
 0xbd6   :  { %v796_v4 = vmul.f32 %v1331_v37, %v791_v2 }
 0xbd8   :  { %v960_v6 = vpack.c.bf16 %v796_v4, %v796_v4 }
 0xbda   :  { %1256 = vmatmul.mubr.msk.bf16.vlgmr.msra.gmra.mrb[16].mxu1 %vm959_vm5, %v960_v6 }
 0xcad   :  { %v905_v8 = vpop.f32.mrb[16].mxu1 }
 0xcae   :  { %v906_v33 = vadd.f32 %v950_v0, %v905_v8  ;;  %v1257_v10 = vpop.f32.mrb[17].mxu1 }
 0xcaf   :  { %v908_v23 = vpop.f32.mrb[18].mxu1 }
 0xcb0   :  { %911 = vst [vmem:[#allocation11] sm:$0xff] %v906_v33  ;;  %v1258_v13 = vpop.f32.mrb[19].mxu1 }
 0xcb1   :  { %1431 = shalt.err (!%p1428_p8)
}
 0xcb2   :  { %s1432_s5 = scalar_lea.hbm %s1851_s6, 128 }
 0xcb3   :  { %p1433_p9 = scmp.ne.s32.totalorder %s1851_s6, %s1432_s5  ;;  %p1436_p10 = scmp.lt.u32.totalorder %s1432_s5, %s1851_s6 }
 0xcb5   :  { %p1438_p11 = pnand %p1436_p10, %p1433_p9 }
 0xcb7   :  { %1441 = shalt.err (!%p1438_p11)
}
 0xcb8   :  { %921 = dma.vmem_to_hbm [thread:$0]  %s919_s25, 128, %s1851_s6, [#allocation5]  }
 0xcb9   :  { %1448 = dma.done.wait [#allocation5], 128  }
 0xcba   :  { %1449 = vsyncadd [#allocation5], 4294967168 }
 0xcbb   :  { %925 = vsyncpa [#allocation4], 1 }
 0xcbc   :  { %926 = vsyncpa [#allocation7], 1 }
 0xcbd   :  { %927 = vsyncpa [#allocation10], 1 }
 0xcbe   :  { %928 = vsyncpa [#allocation5], 1 }

</bundles_post_ra>
